<compile_context>
chip_gen: v7x
topology: tpu7x:2x2x1
jax: 0.10.0
libtpu: 0.0.40
codegen_flags: <defaults>
</compile_context>

<pallas_src>
import functools

import jax
import jax.numpy as jnp
from jax import lax
from jax.experimental import pallas as pl
from jax.experimental.pallas import tpu as pltpu

LANES = 128
MAX_BLOCK_ROWS = 1024  # (1024,128) f32 = 512 KiB/tile; 2 inputs x 2 buffers ~ 2 MiB


def _sublane_multiple(dtype):
    # Minimal sublane tiling per element width (f32: 8, bf16: 16, int8/fp8: 32).
    return {4: 8, 2: 16, 1: 32}.get(jnp.dtype(dtype).itemsize, 8)


def _round_up(x, m):
    return ((x + m - 1) // m) * m


def _focal_loss_kernel(o_ref, t_ref, out_ref, *, alpha, gamma, block_rows,
                       n_full_rows, n_tail_lanes):
    o = o_ref[...].astype(jnp.float32)
    t = t_ref[...].astype(jnp.float32)

    # torch.nn.functional.binary_cross_entropy clamps the log terms at -100.
    log_o = jnp.maximum(jnp.log(o), -100.0)
    log_1mo = jnp.maximum(jnp.log(1.0 - o), -100.0)
    bce = -(t * log_o + (1.0 - t) * log_1mo)

    is_pos = t == 1.0
    alpha_factor = jnp.where(is_pos, jnp.float32(alpha), jnp.float32(1.0 - alpha))
    focal_weight = jnp.where(is_pos, 1.0 - o, o)

    # Strength-reduce the pow: gamma is a static Python float.
    if float(gamma) == 2.0:
        fw_pow = focal_weight * focal_weight
    elif float(gamma).is_integer() and 0.0 <= float(gamma) <= 8.0:
        fw_pow = lax.integer_pow(focal_weight, int(gamma))
    else:
        fw_pow = focal_weight ** jnp.float32(gamma)

    cls_loss = bce * alpha_factor * fw_pow

    # Mask lane-padding and out-of-bounds rows of a partial last block.
    # Validity of element (global_row, lane):
    #   global_row < n_full_rows, or (global_row == n_full_rows and lane < tail).
    r = lax.broadcasted_iota(jnp.int32, (block_rows, LANES), 0)
    c = lax.broadcasted_iota(jnp.int32, (block_rows, LANES), 1)
    g_row = pl.program_id(0) * block_rows + r
    valid = g_row < n_full_rows
    if n_tail_lanes:
        valid = valid | ((g_row == n_full_rows) & (c < n_tail_lanes))
    cls_loss = jnp.where(valid, cls_loss, jnp.float32(0.0))

    # Row-group reduce to a single (8,128) partial tile — pure vreg adds (VPU).
    # The only cross-lane reduce happens once, in the wrapper, over the tiny
    # (num_blocks*8, 128) partials array.
    out_ref[...] = cls_loss.reshape(block_rows // 8, 8, LANES).sum(axis=0)


def focal_loss(output, target, alpha=0.25, gamma=2.0, reduction="elementwise_mean"):
    """Pallas focal loss.  `output` in (0,1), `target` in {0,1}, same shape."""
    assert output.shape == target.shape
    if reduction == "none":
        # TODO(synk): 'none' reduction would return the elementwise map; this
        # kernel only implements the reduced variants used in training.
        raise NotImplementedError("reduction='none' not implemented in kernel")

    numel = output.size

    # Flatten in native dtype (no f32 upcast copy in HBM).
    o_flat = output.reshape(-1)
    t_flat = target.reshape(-1)

    # Pad only to a multiple of 128 lanes (required for the lane-dense reshape);
    # padded / out-of-block elements are masked inside the kernel.
    lane_pad = (-numel) % LANES
    if lane_pad:
        o_flat = jnp.pad(o_flat, (0, lane_pad))
        t_flat = jnp.pad(t_flat, (0, lane_pad))
    rows = (numel + lane_pad) // LANES
    o2 = o_flat.reshape(rows, LANES)
    t2 = t_flat.reshape(rows, LANES)

    sub_mult = max(_sublane_multiple(o2.dtype), _sublane_multiple(t2.dtype))
    block_rows = min(MAX_BLOCK_ROWS, _round_up(rows, sub_mult))
    n_blocks = pl.cdiv(rows, block_rows)

    kernel = functools.partial(
        _focal_loss_kernel,
        alpha=float(alpha),
        gamma=float(gamma),
        block_rows=block_rows,
        n_full_rows=numel // LANES,
        n_tail_lanes=numel % LANES,
    )

    in_bytes = numel * (o2.dtype.itemsize + t2.dtype.itemsize)
    cost = pl.CostEstimate(
        flops=12 * numel,            # muls/adds/selects per element (approx.)
        transcendentals=2 * numel,   # the two clamped logs
        bytes_accessed=in_bytes + n_blocks * 8 * LANES * 4,
    )

    partials = pl.pallas_call(
        kernel,
        out_shape=jax.ShapeDtypeStruct((n_blocks * 8, LANES), jnp.float32),
        grid_spec=pltpu.PrefetchScalarGridSpec(
            num_scalar_prefetch=0,
            grid=(n_blocks,),
            in_specs=[
                pl.BlockSpec((block_rows, LANES), lambda i: (i, 0)),
                pl.BlockSpec((block_rows, LANES), lambda i: (i, 0)),
            ],
            out_specs=pl.BlockSpec((8, LANES), lambda i: (i, 0)),
        ),
        compiler_params=pltpu.CompilerParams(
            dimension_semantics=("parallel",),
        ),
        cost_estimate=cost,
    )(o2, t2)

    loss_sum = jnp.sum(partials)
    if reduction == "sum":
        return loss_sum
    elif reduction == "elementwise_mean":
        return loss_sum / jnp.float32(numel)
    else:
        raise ValueError(reduction)


def _focal_loss_ref(output, target, alpha=0.25, gamma=2.0, reduction="elementwise_mean"):
    o = output.astype(jnp.float32)
    t = target.astype(jnp.float32)
    bce = -(t * jnp.maximum(jnp.log(o), -100.0)
            + (1.0 - t) * jnp.maximum(jnp.log(1.0 - o), -100.0))
    alpha_factor = jnp.where(t == 1.0, alpha, 1.0 - alpha)
    focal_weight = jnp.where(t == 1.0, 1.0 - o, o)
    cls_loss = bce * alpha_factor * focal_weight ** gamma
    s = jnp.sum(cls_loss)
    return s if reduction == "sum" else s / cls_loss.size


if __name__ == "__main__":
    key = jax.random.PRNGKey(0)

    def make_inputs(k, shape, p=0.3):
        k1, k2 = jax.random.split(k)
        logits = jax.random.normal(k1, shape, dtype=jnp.float32)
        output = jax.nn.sigmoid(logits)  # values in (0, 1)
        target = jax.random.bernoulli(k2, p=p, shape=shape).astype(jnp.float32)
        return output, target

    ok = True

    # 1) Small NCHW prediction map (lane-aligned, single block).
    k, key = jax.random.split(key)
    o1, t1 = make_inputs(k, (2, 4, 16, 16))
    loss = jax.block_until_ready(focal_loss(o1, t1))
    ref = _focal_loss_ref(o1, t1)
    ok &= bool(jnp.allclose(loss, ref, rtol=1e-5, atol=1e-6))
    loss_s = jax.block_until_ready(focal_loss(o1, t1, reduction="sum"))
    ref_s = _focal_loss_ref(o1, t1, reduction="sum")
    ok &= bool(jnp.allclose(loss_s, ref_s, rtol=1e-5, atol=1e-5))

    # 2) Non-lane-aligned numel (exercises in-kernel tail masking).
    k, key = jax.random.split(key)
    o2, t2 = make_inputs(k, (2, 500))
    loss2 = jax.block_until_ready(focal_loss(o2, t2))
    ref2 = _focal_loss_ref(o2, t2)
    ok &= bool(jnp.allclose(loss2, ref2, rtol=1e-5, atol=1e-6))

    # 3) Larger map exercising multiple parallel grid blocks.
    k, key = jax.random.split(key)
    o3, t3 = make_inputs(k, (4, 16, 64, 64))
    loss3 = jax.block_until_ready(focal_loss(o3, t3))
    ref3 = _focal_loss_ref(o3, t3)
    ok &= bool(jnp.allclose(loss3, ref3, rtol=1e-5, atol=1e-6))

    assert ok, (loss, ref, loss2, ref2, loss3, ref3)
    print("KERNEL_OK")
</pallas_src>

<mosaic_0001>
module attributes {stable_mosaic.version = 11 : i64} {
  func.func @_focal_loss_kernel(%arg0: i32, %arg1: memref<16x128xf32, #tpu.memory_space<vmem>>, %arg2: memref<16x128xf32, #tpu.memory_space<vmem>>, %arg3: memref<8x128xf32, #tpu.memory_space<vmem>>) attributes {dimension_semantics = [#tpu.dimension_semantics<parallel>], iteration_bounds = array<i64: 1>, scalar_prefetch = 0 : i64, scratch_operands = 0 : i64, tpu.core_type = #tpu.core_type<tc>, window_params = [{transform_indices = @transform_0, window_bounds = array<i64: 16, 128>}, {transform_indices = @transform_1, window_bounds = array<i64: 16, 128>}, {transform_indices = @transform_2, window_bounds = array<i64: 8, 128>}]} {
    %c0 = arith.constant 0 : index
    %c0_0 = arith.constant 0 : index
    %0 = vector.load %arg1[%c0, %c0_0] : memref<16x128xf32, #tpu.memory_space<vmem>>, vector<16x128xf32>
    %c0_1 = arith.constant 0 : index
    %c0_2 = arith.constant 0 : index
    %1 = vector.load %arg2[%c0_1, %c0_2] : memref<16x128xf32, #tpu.memory_space<vmem>>, vector<16x128xf32>
    %2 = math.log %0 : vector<16x128xf32>
    %cst = arith.constant -1.000000e+02 : f32
    %3 = vector.broadcast %cst : f32 to vector<16x128xf32>
    %4 = arith.maximumf %2, %3 : vector<16x128xf32>
    %cst_3 = arith.constant 1.000000e+00 : f32
    %5 = vector.broadcast %cst_3 : f32 to vector<16x128xf32>
    %6 = arith.subf %5, %0 : vector<16x128xf32>
    %7 = math.log %6 : vector<16x128xf32>
    %cst_4 = arith.constant -1.000000e+02 : f32
    %8 = vector.broadcast %cst_4 : f32 to vector<16x128xf32>
    %9 = arith.maximumf %7, %8 : vector<16x128xf32>
    %10 = arith.mulf %1, %4 : vector<16x128xf32>
    %cst_5 = arith.constant 1.000000e+00 : f32
    %11 = vector.broadcast %cst_5 : f32 to vector<16x128xf32>
    %12 = arith.subf %11, %1 : vector<16x128xf32>
    %13 = arith.mulf %12, %9 : vector<16x128xf32>
    %14 = arith.addf %10, %13 : vector<16x128xf32>
    %cst_6 = arith.constant 0.000000e+00 : f32
    %15 = vector.broadcast %cst_6 : f32 to vector<16x128xf32>
    %16 = arith.subf %15, %14 : vector<16x128xf32>
    %cst_7 = arith.constant 1.000000e+00 : f32
    %17 = vector.broadcast %cst_7 : f32 to vector<16x128xf32>
    %18 = arith.cmpf oeq, %1, %17 : vector<16x128xf32>
    %cst_8 = arith.constant 2.500000e-01 : f32
    %cst_9 = arith.constant 7.500000e-01 : f32
    %19 = vector.broadcast %cst_8 : f32 to vector<16x128xf32>
    %20 = vector.broadcast %cst_9 : f32 to vector<16x128xf32>
    %21 = arith.select %18, %19, %20 : vector<16x128xi1>, vector<16x128xf32>
    %cst_10 = arith.constant 1.000000e+00 : f32
    %22 = vector.broadcast %cst_10 : f32 to vector<16x128xf32>
    %23 = arith.subf %22, %0 : vector<16x128xf32>
    %24 = arith.select %18, %23, %0 : vector<16x128xi1>, vector<16x128xf32>
    %25 = arith.mulf %24, %24 : vector<16x128xf32>
    %26 = arith.mulf %16, %21 : vector<16x128xf32>
    %27 = arith.mulf %26, %25 : vector<16x128xf32>
    %28 = tpu.iota {dimensions = array<i32: 0>} : vector<16x128xi32>
    %c16_i32 = arith.constant 16 : i32
    %29 = arith.muli %arg0, %c16_i32 : i32
    %30 = vector.broadcast %29 : i32 to vector<16x128xi32>
    %31 = arith.addi %30, %28 : vector<16x128xi32>
    %c16_i32_11 = arith.constant 16 : i32
    %32 = vector.broadcast %c16_i32_11 : i32 to vector<16x128xi32>
    %33 = arith.cmpi slt, %31, %32 : vector<16x128xi32>
    %cst_12 = arith.constant 0.000000e+00 : f32
    %34 = vector.broadcast %cst_12 : f32 to vector<16x128xf32>
    %35 = arith.select %33, %27, %34 : vector<16x128xi1>, vector<16x128xf32>
    %36 = vector.shape_cast %35 : vector<16x128xf32> to vector<2x8x128xf32>
    %cst_13 = arith.constant dense<0.000000e+00> : vector<8x128xf32>
    %37 = vector.multi_reduction <add>, %36, %cst_13 [0] : vector<2x8x128xf32> to vector<8x128xf32>
    %c0_14 = arith.constant 0 : index
    %c0_15 = arith.constant 0 : index
    %38 = vector.load %arg3[%c0_14, %c0_15] : memref<8x128xf32, #tpu.memory_space<vmem>>, vector<8x128xf32>
    tpu.vector_store %arg3[%c0_14, %c0_15], %37 {strides = array<i32>} : memref<8x128xf32, #tpu.memory_space<vmem>>, vector<8x128xf32>,
    return
  }
  func.func @transform_0(%arg0: i32) -> (i32, i32) {
    %c0_i32 = arith.constant 0 : i32
    %c0_i32_0 = arith.constant 0 : i32
    return %arg0, %c0_i32 : i32, i32
  }
  func.func @transform_1(%arg0: i32) -> (i32, i32) {
    %c0_i32 = arith.constant 0 : i32
    %c0_i32_0 = arith.constant 0 : i32
    return %arg0, %c0_i32 : i32, i32
  }
  func.func @transform_2(%arg0: i32) -> (i32, i32) {
    %c0_i32 = arith.constant 0 : i32
    %c0_i32_0 = arith.constant 0 : i32
    return %arg0, %c0_i32 : i32, i32
  }
}

</mosaic_0001>

<bundles_post_ra>
// kernel: tpu_custom_call.1
= control target key start
LH: loop header
LB: loop body
LE: loop exit
PB: predicated region body
PF: predicated region fallthrough
CT: control target
= control target key end

     0   :  { %7 = vsyncpa [#allocation3], 0  ;;  %s252_s0 = inlined_call_operand.hbm [shape: f32[16,128], index: 0, kind: input, shape index: {}]   ;;  %s253_s1 = inlined_call_operand.hbm [shape: f32[16,128], index: 1, kind: input, shape index: {}]   ;;  %s254_s2 = inlined_call_operand.hbm [shape: f32[8,128], index: 2, kind: output, shape index: {}]  }
   0x1   :  { %8 = vsyncpa [#allocation6], 0 }
   0x2   :  { %9 = vsyncpa [#allocation4], 0  ;;  %s195_s9 = smov [#allocation2]   ;;  %s123_s13 = scalar_lea.hbm %s252_s0, 256 }
   0x3   :  { %s15_s10 = sshll.u32 %s195_s9, 4  ;;  %p124_p0 = scmp.ne.s32.totalorder %s252_s0, %s123_s13  ;;  %s16_s10 = int_to_ptr.vmem [resolvable:$true] %s15_s10 }
   0x4   :  { %p127_p1 = scmp.lt.u32.totalorder %s123_s13, %s252_s0 }
   0x6   :  { %p129_p2 = pnand %p127_p1, %p124_p0 }
   0x8   :  { %132 = shalt.err (!%p129_p2)
}
   0x9   :  { %s133_s18 = scalar_lea.vmem %s16_s10, 256  ;;  %p138_p4 = scmp.lt.s32.totalorder %s16_s10, %s16_s10 }
   0xa   :  { %p134_p3 = scmp.ne.s32.totalorder %s16_s10, %s133_s18  ;;  %p139_p5 = scmp.lt.s32.totalorder %s133_s18, %s133_s18 }
   0xc   :  { %p140_p6 = por %p139_p5, %p138_p4 }
   0xe   :  { %p141_p7 = pnand %p140_p6, %p134_p3 }
  0x10   :  { %144 = shalt.err (!%p141_p7)
}
  0x11   :  { %s196_s19 = smov 128   ;;  %s197_s20 = smov 8  }
  0x12   :  { %21 = dma.hbm_to_vmem [thread:$0]  %s252_s0, 256, %s16_s10, [#allocation3], %s196_s19, %s196_s19, %s197_s20  }
  0x13   :  { %s198_s23 = smov [#allocation5]   ;;  %s145_s27 = scalar_lea.hbm %s253_s1, 256 }
  0x14   :  { %s27_s24 = sshll.u32 %s198_s23, 4  ;;  %p146_p8 = scmp.ne.s32.totalorder %s253_s1, %s145_s27  ;;  %s28_s24 = int_to_ptr.vmem [resolvable:$true] %s27_s24 }
  0x15   :  { %p149_p9 = scmp.lt.u32.totalorder %s145_s27, %s253_s1 }
  0x17   :  { %p151_p10 = pnand %p149_p9, %p146_p8 }
  0x19   :  { %154 = shalt.err (!%p151_p10)
}
  0x1a   :  { %s155_s4 = scalar_lea.vmem %s28_s24, 256  ;;  %p160_p12 = scmp.lt.s32.totalorder %s28_s24, %s28_s24 }
  0x1b   :  { %p156_p11 = scmp.ne.s32.totalorder %s28_s24, %s155_s4  ;;  %p161_p13 = scmp.lt.s32.totalorder %s155_s4, %s155_s4 }
  0x1d   :  { %p162_p0 = por %p161_p13, %p160_p12 }
  0x1f   :  { %p163_p1 = pnand %p162_p0, %p156_p11 }
  0x21   :  { %166 = shalt.err (!%p163_p1)
}
  0x22   :  { %33 = dma.hbm_to_vmem [thread:$0]  %s253_s1, 256, %s28_s24, [#allocation6], %s196_s19, %s196_s19, %s197_s20  }
  0x23   :  { %189 = dma.done.wait [#allocation3], 256  }
  0x24   :  { %190 = vsyncadd [#allocation3], 4294967040 }
  0x25   :  { %191 = dma.done.wait [#allocation6], 256  }
  0x26   :  { %192 = vsyncadd [#allocation6], 4294967040  ;;  %v40_v0 = vld [vmem:[#allocation2] sm:$0xff]  ;;  %v41_v1 = vld [vmem:[#allocation2 + $0x8] sm:$0xff]  ;;  %v199_v28 = vmov 0.75   ;;  %s200_s1 = smov [#allocation7]  }
  0x27   :  { %115 = vlog2.f32 %v40_v0  ;;  %v50_v2 = vsub.f32 1.0, %v40_v0  ;;  %v51_v3 = vsub.f32 1.0, %v41_v1  ;;  %v42_v5 = vld [vmem:[#allocation5] sm:$0xff]  ;;  %v43_v7 = vld [vmem:[#allocation5 + $0x8] sm:$0xff]  ;;  %s99_s6 = sshll.u32 %s200_s1, 4  ;;  %s100_s6 = int_to_ptr.vmem [resolvable:$true] %s99_s6 }
  0x28   :  { %117 = vlog2.f32 %v41_v1  ;;  %v60_v14 = vsub.f32 1.0, %v42_v5  ;;  %v61_v17 = vsub.f32 1.0, %v43_v7  ;;  %vm68_vm0 = vcmp.eq.f32.partialorder %v42_v5, 1.0  ;;  %s167_s7 = scalar_lea.vmem %s100_s6, 128  ;;  %p172_p3 = scmp.lt.s32.totalorder %s100_s6, %s100_s6 }
  0x29   :  { %119 = vlog2.f32 %v50_v2  ;;  %vm69_vm1 = vcmp.eq.f32.partialorder %v43_v7, 1.0  ;;  %v72_v24 = vsel %vm68_vm0, %v50_v2, %v40_v0  ;;  %v70_v29 = vsel %vm68_vm0, 0.25, %v199_v28  ;;  %p168_p2 = scmp.ne.s32.totalorder %s100_s6, %s167_s7  ;;  %p173_p4 = scmp.lt.s32.totalorder %s167_s7, %s167_s7 }
  0x2a   :  { %121 = vlog2.f32 %v51_v3  ;;  %v73_v26 = vsel %vm69_vm1, %v51_v3, %v41_v1  ;;  %v71_v31 = vsel %vm69_vm1, 0.25, %v199_v28  ;;  %v74_v32 = vmul.f32 %v72_v24, %v72_v24 }
  0x2b   :  { %v75_v34 = vmul.f32 %v73_v26, %v73_v26  ;;  %p174_p5 = por %p173_p4, %p172_p3 }
  0x2d   :  { %p175_p6 = pnand %p174_p5, %p168_p2 }
  0x31   :  { %v116_v4 = vpop.eup %115 }
  0x32   :  { %v118_v6 = vpop.eup %117  ;;  %v45_v8 = vmul.f32 0.6931472, %v116_v4 }
  0x33   :  { %v120_v9 = vpop.eup %119  ;;  %v47_v10 = vmul.f32 0.6931472, %v118_v6 }
  0x34   :  { %v122_v11 = vpop.eup %121  ;;  %v48_v12 = vmax.f32 %v45_v8, -100.0  ;;  %v53_v13 = vmul.f32 0.6931472, %v120_v9 }
  0x35   :  { %v49_v15 = vmax.f32 %v47_v10, -100.0  ;;  %v55_v16 = vmul.f32 0.6931472, %v122_v11 }
  0x36   :  { %v56_v18 = vmax.f32 %v53_v13, -100.0  ;;  %v58_v19 = vmul.f32 %v48_v12, %v42_v5 }
  0x37   :  { %v57_v20 = vmax.f32 %v55_v16, -100.0  ;;  %v59_v21 = vmul.f32 %v49_v15, %v43_v7 }
  0x38   :  { %v62_v22 = vmul.f32 %v60_v14, %v56_v18 }
  0x39   :  { %v63_v23 = vmul.f32 %v61_v17, %v57_v20 }
  0x3a   :  { %v64_v25 = vadd.f32 %v62_v22, %v58_v19 }
  0x3b   :  { %v65_v27 = vadd.f32 %v63_v23, %v59_v21 }
  0x3c   :  { %v66_v30 = vsub.f32 0.0, %v64_v25 }
  0x3d   :  { %v67_v33 = vsub.f32 0.0, %v65_v27 }
  0x3e   :  { %v76_v35 = vmul.f32 %v70_v29, %v66_v30 }
  0x3f   :  { %v77_v36 = vmul.f32 %v71_v31, %v67_v33 }
  0x40   :  { %v78_v37 = vmul.f32 %v76_v35, %v74_v32 }
  0x41   :  { %v79_v38 = vmul.f32 %v77_v36, %v75_v34 }
  0x43   :  { %v91_v39 = vadd.f32 %v79_v38, %v78_v37 }
  0x45   :  { %92 = vst [vmem:[#allocation7] sm:$0xff] %v91_v39 }
  0x46   :  { %178 = shalt.err (!%p175_p6)
}
  0x47   :  { %s179_s10 = scalar_lea.hbm %s254_s2, 128 }
  0x48   :  { %p180_p7 = scmp.ne.s32.totalorder %s254_s2, %s179_s10  ;;  %p183_p8 = scmp.lt.u32.totalorder %s179_s10, %s254_s2 }
  0x4a   :  { %p185_p9 = pnand %p183_p8, %p180_p7 }
  0x4c   :  { %188 = shalt.err (!%p185_p9)
}
  0x4d   :  { %102 = dma.vmem_to_hbm [thread:$0]  %s100_s6, 128, %s254_s2, [#allocation4]  }
  0x4e   :  { %193 = dma.done.wait [#allocation4], 128  }
  0x4f   :  { %194 = vsyncadd [#allocation4], 4294967168 }
  0x50   :  { %106 = vsyncpa [#allocation3], 1 }
  0x51   :  { %107 = vsyncpa [#allocation6], 1 }
  0x52   :  { %108 = vsyncpa [#allocation4], 1 }

</bundles_post_ra>
